<compile_context>
chip_gen: v5e
topology: v5e:2x2
jax: 0.10.0
libtpu: 0.0.40
codegen_flags: <defaults>
</compile_context>

<pallas_src>
import functools

import jax
import jax.numpy as jnp
from jax.experimental import pallas as pl
from jax.experimental.pallas import tpu as pltpu


_COLS = 128                    # lane width: every (rows, 128) view is lane-dense
_ACC_ROWS = 512                # fixed accumulator height (512x128 f32 = 256 KiB)
_SUB = 32                      # sublane granularity covering f32/bf16/int8 packing
_TARGET_BLOCK_BYTES = 4 << 20  # ~4 MiB per input per grid step (sized in bytes)
_VMEM_LIMIT_BYTES = 32 << 20   # fits 2 inputs x 2 bufs x 4 MiB + acc on every chip


def _round_up(x, m):
    return ((x + m - 1) // m) * m


def _num_tensorcores():
    """TensorCores per JAX device: 2 on megacore chips (v4/v5p) and TPU7x, else 1."""
    try:
        kind = jax.devices()[0].device_kind.lower()
    except Exception:
        return 1
    if ("v4" in kind) or ("v5p" in kind) or ("7" in kind):
        return 2
    return 1


def _mse_kernel(p_ref, t_ref, out_ref, acc_ref, *, inv_n, valid_rows, block_rows,
                acc_rows, blocks_total, blocks_per_core, grid_cores):
    c = pl.program_id(0)   # core / partial-sum index ("parallel")
    i = pl.program_id(1)   # per-core reduction sweep ("arbitrary")
    gblk = c * blocks_per_core + i

    @pl.when(i == 0)
    def _():
        acc_ref[...] = jnp.zeros_like(acc_ref)

    n_chunks = block_rows // acc_rows

    def accumulate(apply_row_mask):
        # Chunked, pure-VPU accumulate into the fixed-size accumulator; the
        # mask is only emitted for the (single) ragged boundary block.
        for k in range(n_chunks):
            rs = pl.ds(k * acc_rows, acc_rows)
            d = (p_ref[rs, :].astype(jnp.float32)
                 - t_ref[rs, :].astype(jnp.float32))
            sq = d * d
            if apply_row_mask:
                row0 = gblk * block_rows + k * acc_rows
                rid = row0 + jax.lax.broadcasted_iota(jnp.int32, (acc_rows, _COLS), 0)
                sq = jnp.where(rid < valid_rows, sq, 0.0)
            acc_ref[...] += sq

    ragged = (valid_rows % block_rows) != 0                    # static (trace time)
    overflow = grid_cores * blocks_per_core > blocks_total     # static (trace time)

    if (not ragged) and (not overflow):
        accumulate(False)                                      # clean hot path
    else:
        last = blocks_total - 1

        @pl.when(gblk < last)
        def _():
            accumulate(False)                                  # interior blocks: no mask

        @pl.when(gblk == last)
        def _():
            accumulate(ragged)                                 # boundary block: mask OOB rows
        # gblk > last (only when `overflow`): duplicated clamped block, skipped entirely.

    @pl.when(i == pl.num_programs(1) - 1)
    def _():
        # One cross-lane/sublane reduce + 1/n scale per core, paid once.
        out_ref[0, 0] = jnp.sum(acc_ref[...]) * jnp.float32(inv_n)


def ar_loss(pred, target):
    """MSE loss (mean reduction) matching nn.MSELoss()(pred, target.float())."""
    n = pred.size
    assert n > 0, "empty input"
    assert target.size == n, "pred/target must have the same number of elements"

    p_flat = pred.reshape(-1)     # free reshape, native dtype (cast happens in-kernel)
    t_flat = target.reshape(-1)

    rem = n % _COLS
    if rem:
        # Unavoidable single materialization pass in this case; pad is <128
        # elements and identical zeros on both operands (contributes 0).
        pad = _COLS - rem
        p_flat = jnp.pad(p_flat, (0, pad))
        t_flat = jnp.pad(t_flat, (0, pad))
    rows = (n + _COLS - 1) // _COLS

    p2d = p_flat.reshape(rows, _COLS)   # reshape of contiguous buffer: free
    t2d = t_flat.reshape(rows, _COLS)

    # Block sized by bytes (wider operand dtype bounds the VMEM footprint).
    max_item = max(pred.dtype.itemsize, target.dtype.itemsize)
    target_rows = max(_ACC_ROWS, _TARGET_BLOCK_BYTES // (_COLS * max_item))
    if rows >= _ACC_ROWS:
        acc_rows = _ACC_ROWS
        block_rows = min(target_rows, _round_up(rows, _ACC_ROWS))
    else:
        block_rows = _round_up(rows, _SUB)
        acc_rows = block_rows
    blocks_total = pl.cdiv(rows, block_rows)

    num_cores = min(_num_tensorcores(), blocks_total)
    blocks_per_core = pl.cdiv(blocks_total, num_cores)

    # Clamp so overflow iterations (only possible when num_cores > 1 and
    # blocks_total % num_cores != 0) re-read an in-bounds block; their
    # contribution is skipped inside the kernel.
    in_map = lambda c, i: (jnp.minimum(c * blocks_per_core + i, blocks_total - 1), 0)

    kernel = functools.partial(
        _mse_kernel,
        inv_n=1.0 / float(n),
        valid_rows=rows,
        block_rows=block_rows,
        acc_rows=acc_rows,
        blocks_total=blocks_total,
        blocks_per_core=blocks_per_core,
        grid_cores=num_cores,
    )

    partials = pl.pallas_call(
        kernel,
        out_shape=jax.ShapeDtypeStruct((num_cores, 1), jnp.float32),
        grid_spec=pltpu.PrefetchScalarGridSpec(
            num_scalar_prefetch=0,
            grid=(num_cores, blocks_per_core),
            in_specs=[
                pl.BlockSpec((block_rows, _COLS), in_map),
                pl.BlockSpec((block_rows, _COLS), in_map),
            ],
            out_specs=pl.BlockSpec(
                (1, 1), lambda c, i: (c, 0), memory_space=pltpu.SMEM
            ),
            scratch_shapes=[pltpu.VMEM((acc_rows, _COLS), jnp.float32)],
        ),
        compiler_params=pltpu.CompilerParams(
            dimension_semantics=("parallel", "arbitrary"),
            vmem_limit_bytes=_VMEM_LIMIT_BYTES,
        ),
        cost_estimate=pl.CostEstimate(
            flops=3 * n,
            transcendentals=0,
            bytes_accessed=n * (pred.dtype.itemsize + target.dtype.itemsize)
            + 4 * num_cores,
        ),
    )(p2d, t2d)

    # Each per-core partial already carries the 1/n factor; just add them.
    return jnp.sum(partials)


if __name__ == "__main__":
    # ARLoss.__init__ holds no learnable parameters (only an MSELoss criterion),
    # so there are no weights to initialize.
    loss_fn = jax.jit(ar_loss)
    root = jax.random.PRNGKey(0)

    # 1) Small NCHW regression output, 128-aligned element count -> zero-copy path.
    k1p, k1t, k2p, k2t, k3p, k3t = jax.random.split(root, 6)
    pred1 = jax.random.normal(k1p, (2, 4, 16, 16), dtype=jnp.float32)
    targ1 = jax.random.normal(k1t, (2, 4, 16, 16), dtype=jnp.float32)
    loss1 = jax.block_until_ready(loss_fn(pred1, targ1))
    ref1 = jnp.mean((pred1 - targ1.astype(jnp.float32)) ** 2)
    assert jnp.allclose(loss1, ref1, rtol=1e-5, atol=1e-6), (loss1, ref1)

    # 2) Misaligned element count + non-f32 target exercises the minimal-pad
    #    path and the in-kernel target.float() cast.
    pred2 = jax.random.normal(k2p, (3, 5, 7), dtype=jnp.float32)
    targ2 = jax.random.normal(k2t, (3, 5, 7), dtype=jnp.float32).astype(jnp.bfloat16)
    loss2 = jax.block_until_ready(loss_fn(pred2, targ2))
    ref2 = jnp.mean((pred2 - targ2.astype(jnp.float32)) ** 2)
    assert jnp.allclose(loss2, ref2, rtol=1e-5, atol=1e-6), (loss2, ref2)

    # 3) Larger input exercises the multi-block streaming sweep with a ragged,
    #    mask-handled boundary block (still no padding: n % 128 == 0).
    pred3 = jax.random.normal(k3p, (4, 1, 520, 520), dtype=jnp.float32)
    targ3 = jax.random.normal(k3t, (4, 1, 520, 520), dtype=jnp.float32)
    loss3 = jax.block_until_ready(loss_fn(pred3, targ3))
    ref3 = jnp.mean((pred3 - targ3) ** 2)
    assert jnp.allclose(loss3, ref3, rtol=1e-5, atol=1e-6), (loss3, ref3)

    print("KERNEL_OK")
</pallas_src>

<mosaic_0001>
module attributes {stable_mosaic.version = 11 : i64} {
  func.func @_mse_kernel(%arg0: i32, %arg1: i32, %arg2: memref<32x128xf32, #tpu.memory_space<vmem>>, %arg3: memref<32x128xf32, #tpu.memory_space<vmem>>, %arg4: memref<1x1xf32, #tpu.memory_space<smem>>, %arg5: memref<32x128xf32, #tpu.memory_space<vmem>>) attributes {dimension_semantics = [#tpu.dimension_semantics<parallel>, #tpu.dimension_semantics<arbitrary>], iteration_bounds = array<i64: 1, 1>, scalar_prefetch = 0 : i64, scratch_operands = 1 : i64, tpu.core_type = #tpu.core_type<tc>, window_params = [{transform_indices = @transform_0, window_bounds = array<i64: 32, 128>}, {transform_indices = @transform_1, window_bounds = array<i64: 32, 128>}, {transform_indices = @transform_2, window_bounds = array<i64: 1, 1>}]} {
    %c1_i32 = arith.constant 1 : i32
    %0 = arith.muli %arg0, %c1_i32 : i32
    %1 = arith.addi %0, %arg1 : i32
    %c0_i32 = arith.constant 0 : i32
    %2 = arith.cmpi eq, %arg1, %c0_i32 : i32
    %3 = arith.extui %2 : i1 to i32
    %c0_i32_0 = arith.constant 0 : i32
    %4 = arith.cmpi ne, %3, %c0_i32_0 : i32
    scf.if %4 {
      %cst = arith.constant 0.000000e+00 : f32
      %14 = vector.broadcast %cst : f32 to vector<32x128xf32>
      %c0 = arith.constant 0 : index
      %c0_7 = arith.constant 0 : index
      %15 = vector.load %arg5[%c0, %c0_7] : memref<32x128xf32, #tpu.memory_space<vmem>>, vector<32x128xf32>
      tpu.vector_store %arg5[%c0, %c0_7], %14 {strides = array<i32>} : memref<32x128xf32, #tpu.memory_space<vmem>>, vector<32x128xf32>,
    } else {
    }
    %c0_i32_1 = arith.constant 0 : i32
    %5 = arith.cmpi slt, %1, %c0_i32_1 : i32
    %6 = arith.extui %5 : i1 to i32
    %c0_i32_2 = arith.constant 0 : i32
    %7 = arith.cmpi ne, %6, %c0_i32_2 : i32
    scf.if %7 {
      %c0 = arith.constant 0 : index
      %c0_7 = arith.constant 0 : index
      %14 = vector.load %arg2[%c0, %c0_7] : memref<32x128xf32, #tpu.memory_space<vmem>>, vector<32x128xf32>
      %c0_8 = arith.constant 0 : index
      %c0_9 = arith.constant 0 : index
      %15 = vector.load %arg3[%c0_8, %c0_9] : memref<32x128xf32, #tpu.memory_space<vmem>>, vector<32x128xf32>
      %16 = arith.subf %14, %15 : vector<32x128xf32>
      %17 = arith.mulf %16, %16 : vector<32x128xf32>
      %c0_10 = arith.constant 0 : index
      %c0_11 = arith.constant 0 : index
      %18 = vector.load %arg5[%c0_10, %c0_11] : memref<32x128xf32, #tpu.memory_space<vmem>>, vector<32x128xf32>
      %19 = arith.addf %18, %17 : vector<32x128xf32>
      %c0_12 = arith.constant 0 : index
      %c0_13 = arith.constant 0 : index
      %20 = vector.load %arg5[%c0_12, %c0_13] : memref<32x128xf32, #tpu.memory_space<vmem>>, vector<32x128xf32>
      tpu.vector_store %arg5[%c0_12, %c0_13], %19 {strides = array<i32>} : memref<32x128xf32, #tpu.memory_space<vmem>>, vector<32x128xf32>,
    } else {
    }
    %c0_i32_3 = arith.constant 0 : i32
    %8 = arith.cmpi eq, %1, %c0_i32_3 : i32
    %9 = arith.extui %8 : i1 to i32
    %c0_i32_4 = arith.constant 0 : i32
    %10 = arith.cmpi ne, %9, %c0_i32_4 : i32
    scf.if %10 {
      %c0 = arith.constant 0 : index
      %c0_7 = arith.constant 0 : index
      %14 = vector.load %arg2[%c0, %c0_7] : memref<32x128xf32, #tpu.memory_space<vmem>>, vector<32x128xf32>
      %c0_8 = arith.constant 0 : index
      %c0_9 = arith.constant 0 : index
      %15 = vector.load %arg3[%c0_8, %c0_9] : memref<32x128xf32, #tpu.memory_space<vmem>>, vector<32x128xf32>
      %16 = arith.subf %14, %15 : vector<32x128xf32>
      %17 = arith.mulf %16, %16 : vector<32x128xf32>
      %c32_i32 = arith.constant 32 : i32
      %18 = arith.muli %1, %c32_i32 : i32
      %c0_i32_10 = arith.constant 0 : i32
      %19 = arith.addi %18, %c0_i32_10 : i32
      %20 = tpu.iota {dimensions = array<i32: 0>} : vector<32x128xi32>
      %21 = vector.broadcast %19 : i32 to vector<32x128xi32>
      %22 = arith.addi %21, %20 : vector<32x128xi32>
      %c16_i32 = arith.constant 16 : i32
      %23 = vector.broadcast %c16_i32 : i32 to vector<32x128xi32>
      %24 = arith.cmpi slt, %22, %23 : vector<32x128xi32>
      %cst = arith.constant 0.000000e+00 : f32
      %25 = vector.broadcast %cst : f32 to vector<32x128xf32>
      %26 = arith.select %24, %17, %25 : vector<32x128xi1>, vector<32x128xf32>
      %c0_11 = arith.constant 0 : index
      %c0_12 = arith.constant 0 : index
      %27 = vector.load %arg5[%c0_11, %c0_12] : memref<32x128xf32, #tpu.memory_space<vmem>>, vector<32x128xf32>
      %28 = arith.addf %27, %26 : vector<32x128xf32>
      %c0_13 = arith.constant 0 : index
      %c0_14 = arith.constant 0 : index
      %29 = vector.load %arg5[%c0_13, %c0_14] : memref<32x128xf32, #tpu.memory_space<vmem>>, vector<32x128xf32>
      tpu.vector_store %arg5[%c0_13, %c0_14], %28 {strides = array<i32>} : memref<32x128xf32, #tpu.memory_space<vmem>>, vector<32x128xf32>,
    } else {
    }
    %c0_i32_5 = arith.constant 0 : i32
    %11 = arith.cmpi eq, %arg1, %c0_i32_5 : i32
    %12 = arith.extui %11 : i1 to i32
    %c0_i32_6 = arith.constant 0 : i32
    %13 = arith.cmpi ne, %12, %c0_i32_6 : i32
    scf.if %13 {
      %c0 = arith.constant 0 : index
      %c0_7 = arith.constant 0 : index
      %14 = vector.load %arg5[%c0, %c0_7] : memref<32x128xf32, #tpu.memory_space<vmem>>, vector<32x128xf32>
      %15 = vector.shape_cast %14 : vector<32x128xf32> to vector<1x32x128xf32>
      %cst = arith.constant dense<0.000000e+00> : vector<1xf32>
      %16 = vector.multi_reduction <add>, %15, %cst [1, 2] : vector<1x32x128xf32> to vector<1xf32>
      %17 = vector.shape_cast %16 : vector<1xf32> to vector<1x1x1xf32>
      %18 = vector.extract %17[0, 0, 0] : f32 from vector<1x1x1xf32>
      %cst_8 = arith.constant 4.8828125E-4 : f32
      %19 = arith.mulf %18, %cst_8 : f32
      %c0_9 = arith.constant 0 : index
      %c0_10 = arith.constant 0 : index
      %20 = memref.load %arg4[%c0_9, %c0_10] : memref<1x1xf32, #tpu.memory_space<smem>>
      memref.store %19, %arg4[%c0_9, %c0_10] : memref<1x1xf32, #tpu.memory_space<smem>>
    } else {
    }
    return
  }
  func.func @transform_0(%arg0: i32, %arg1: i32) -> (i32, i32) {
    %c1_i32 = arith.constant 1 : i32
    %0 = arith.muli %arg0, %c1_i32 : i32
    %1 = arith.addi %0, %arg1 : i32
    %c0_i32 = arith.constant 0 : i32
    %2 = arith.minsi %1, %c0_i32 : i32
    %c0_i32_0 = arith.constant 0 : i32
    %c0_i32_1 = arith.constant 0 : i32
    return %2, %c0_i32_0 : i32, i32
  }
  func.func @transform_1(%arg0: i32, %arg1: i32) -> (i32, i32) {
    %c1_i32 = arith.constant 1 : i32
    %0 = arith.muli %arg0, %c1_i32 : i32
    %1 = arith.addi %0, %arg1 : i32
    %c0_i32 = arith.constant 0 : i32
    %2 = arith.minsi %1, %c0_i32 : i32
    %c0_i32_0 = arith.constant 0 : i32
    %c0_i32_1 = arith.constant 0 : i32
    return %2, %c0_i32_0 : i32, i32
  }
  func.func @transform_2(%arg0: i32, %arg1: i32) -> (i32, i32) {
    %c0_i32 = arith.constant 0 : i32
    %c0_i32_0 = arith.constant 0 : i32
    return %arg0, %c0_i32 : i32, i32
  }
}

</mosaic_0001>

<bundles_post_ra>
// kernel: ar_loss.1
= control target key start
LH: loop header
LB: loop body
LE: loop exit
PB: predicated region body
PF: predicated region fallthrough
CT: control target
= control target key end

     0   :  { %s285_s0 = inlined_call_operand.vmem [shape: f32[16,128], index: 0, kind: input, shape index: {}]   ;;  %s286_s1 = inlined_call_operand.vmem [shape: f32[16,128], index: 1, kind: input, shape index: {}]   ;;  %s287_s2 = inlined_call_operand.hbm [shape: f32[1,1], index: 2, kind: output, shape index: {}]  }
   0x1   :  { %v141_v0 = vld [vmem:[%s285_s0] sm:$0xff]  ;;  %v142_v1 = vld [vmem:[%s285_s0 + $0x8] sm:$0xff] }
   0x2   :  { %v145_v2 = vld [vmem:[%s286_s1] sm:$0xff]  ;;  %v146_v3 = vld [vmem:[%s286_s1 + $0x8] sm:$0xff] }
   0x3   :  { %v149_v4 = vsub.f32 %v141_v0, %v145_v2 }
   0x4   :  { %7 = vsyncpa [#allocation4], 0  ;;  %v150_v5 = vsub.f32 %v142_v1, %v146_v3  ;;  %s215_s18 = sshll.u32 %s287_s2, 4  ;;  %s254_s20 = smov [#allocation3]   ;;  %s216_s18 = int_to_ptr.hbm [resolvable:$true] %s215_s18 }
   0x5   :  { %v153_v6 = vmul.f32 %v149_v4, %v149_v4 }
   0x6   :  { %v154_v7 = vmul.f32 %v150_v5, %v150_v5 }
   0x8   :  { %v195_v8 = vadd.f32 %v154_v7, %v153_v6 }
   0xa   :  { %198 = vadd.xlane.f32.xlu0 %v195_v8 }
  0x7d   :  { %v199_v9 = vpop.xlane.xlu0 %198 }
  0x7e   :  { %v200_v10 = vrot.slane %v199_v9, 4 }
  0x80   :  { %v201_v11 = vadd.f32 %v200_v10, %v199_v9 }
  0x82   :  { %v202_v12 = vrot.slane %v201_v11, 2 }
  0x84   :  { %v203_v13 = vadd.f32 %v202_v12, %v201_v11 }
  0x86   :  { %v204_v14 = vrot.slane %v203_v13, 1 }
  0x88   :  { %v205_v15 = vadd.f32 %v204_v14, %v203_v13 }
  0x8a   :  { %237 = vpush %v205_v15 }
  0xbb   :  { %s238_s1 = spop %237 }
  0xbc   :  { %s207_s19 = smul.f32 0.00048828125, %s238_s1 }
  0xbe   :  { %209 = sst [smem:[#allocation3]] %s207_s19 }
  0xbf   :  { %218 = dma.smem_to_hbm %s254_s20, 16, %s216_s18, [#allocation4]  }
  0xc0   :  { %252 = dma.done.wait [#allocation4], 16  }
  0xc1   :  { %253 = vsyncadd [#allocation4], 4294967280 }
  0xc2   :  { %223 = sfence }
  0xc3   :  { %224 = vsyncpa [#allocation4], 1 }

</bundles_post_ra>
